<compile_context>
chip_gen: v6e
topology: v6e:2x2x1
jax: 0.10.0
libtpu: 0.0.40
codegen_flags: <defaults>
</compile_context>

<pallas_src>
import jax
import jax.numpy as jnp
from jax.experimental import pallas as pl
from jax.experimental.pallas import tpu as pltpu

LANES = 128                 # vreg lane width
MAX_TILE_ROWS = 8192        # 8192 x 128 x 4B = 4 MiB per f32 buffer
SINGLE_BLOCK_ROWS = 1024    # <= 512 KiB: one full-array block, no tiling needed


def affine_kernel(ac_ref, x_ref, o_ref):
    # ac_ref: (2,) f32 in SMEM -> [a, c];  x_ref / o_ref: (tile_r, 128) f32 in VMEM.
    o_ref[...] = x_ref[...] * ac_ref[0] + ac_ref[1]


def _fold_params(w1, b1, w2, b2):
    # y = layer2(layer1(x)) = (x @ w1.T + b1) @ w2.T + b2 = a*x + c with scalar a, c.
    a = (w2 @ w1).reshape(())        # (1,2)@(2,1) -> scalar
    c = (w2 @ b1 + b2).reshape(())   # (1,2)@(2,) + (1,) -> scalar
    return jnp.stack([a, c]).astype(jnp.float32)  # (2,)


def _choose_tile_rows(rows):
    # Small: one block equal to the full array (always satisfies the block rules,
    # no masking).  Large: multiple-of-8 tile, capped at MAX_TILE_ROWS, sized so the
    # grid has >= 2 steps (keeps both v7x TensorCores busy).
    if rows <= SINGLE_BLOCK_ROWS:
        return rows
    half = -(-rows // 2)                       # cdiv(rows, 2)
    return min(MAX_TILE_ROWS, -(-half // 8) * 8)


def mymodule_forward(x, w1, b1, w2, b2):
    """x: (N,1). w1: (2,1), b1: (2,), w2: (1,2), b2: (1,)  (PyTorch (out,in) layout)."""
    n = x.shape[0]
    ac = _fold_params(w1, b1, w2, b2)

    x_flat = x.reshape(-1).astype(jnp.float32)     # (N,1) -> (N,): free
    rem = n % LANES
    if rem:
        # Minimal pad (<=127 elements) so the lane-dense (rows, 128) view exists.
        x_flat = jnp.pad(x_flat, (0, LANES - rem))
    rows = x_flat.shape[0] // LANES
    x2d = x_flat.reshape(rows, LANES)              # free bitcast when rem == 0

    tile_r = _choose_tile_rows(rows)
    grid = (pl.cdiv(rows, tile_r),)                # last block may be partial (masked)
    n_padded = rows * LANES

    out2d = pl.pallas_call(
        affine_kernel,
        out_shape=jax.ShapeDtypeStruct((rows, LANES), jnp.float32),
        grid=grid,
        in_specs=[
            pl.BlockSpec(memory_space=pltpu.MemorySpace.SMEM),   # (2,) folded scalars
            pl.BlockSpec((tile_r, LANES), lambda i: (i, 0)),     # streamed x tile
        ],
        out_specs=pl.BlockSpec((tile_r, LANES), lambda i: (i, 0)),
        compiler_params=pltpu.CompilerParams(
            dimension_semantics=("parallel",),
            vmem_limit_bytes=32 * 1024 * 1024,
        ),
        cost_estimate=pl.CostEstimate(
            flops=2 * n_padded,
            transcendentals=0,
            bytes_accessed=8 * n_padded + 8,
        ),
    )(ac, x2d)

    if rem:
        return out2d.reshape(-1)[:n].reshape(n, 1)
    return out2d.reshape(n, 1)


def _init_params(key):
    # Deterministic init mimicking nn.Linear defaults (uniform +/- 1/sqrt(fan_in)).
    k1, k2, k3, k4 = jax.random.split(key, 4)
    bound1 = 1.0 / jnp.sqrt(1.0)   # layer1: in_features = 1
    bound2 = 1.0 / jnp.sqrt(2.0)   # layer2: in_features = 2
    w1 = jax.random.uniform(k1, (2, 1), jnp.float32, -bound1, bound1)
    b1 = jax.random.uniform(k2, (2,), jnp.float32, -bound1, bound1)
    w2 = jax.random.uniform(k3, (1, 2), jnp.float32, -bound2, bound2)
    b2 = jax.random.uniform(k4, (1,), jnp.float32, -bound2, bound2)
    return w1, b1, w2, b2


if __name__ == "__main__":
    key = jax.random.PRNGKey(0)
    kx, kp = jax.random.split(key)
    w1, b1, w2, b2 = _init_params(kp)

    def ref_fwd(xv):
        return (xv @ w1.T + b1) @ w2.T + b2   # same math as the PyTorch module

    # Small batch consistent with the module (in_features = 1).
    x = jax.random.normal(kx, (8, 1), jnp.float32)
    out = jax.block_until_ready(mymodule_forward(x, w1, b1, w2, b2))
    assert out.shape == (8, 1)
    assert jnp.allclose(out, ref_fwd(x), atol=1e-5, rtol=1e-5)

    # Non-multiple-of-128 batch: exercises the minimal-pad + tail-slice path.
    x_odd = jax.random.normal(kx, (5000, 1), jnp.float32)
    out_odd = jax.block_until_ready(mymodule_forward(x_odd, w1, b1, w2, b2))
    assert out_odd.shape == (5000, 1)
    assert jnp.allclose(out_odd, ref_fwd(x_odd), atol=1e-5, rtol=1e-5)

    # Multiple-of-128 batch: pad-free path, 2-step grid, partial last block masked.
    x_big = jax.random.normal(kx, (131200, 1), jnp.float32)   # 1025 rows of 128
    out_big = jax.block_until_ready(mymodule_forward(x_big, w1, b1, w2, b2))
    assert out_big.shape == (131200, 1)
    assert jnp.allclose(out_big, ref_fwd(x_big), atol=1e-5, rtol=1e-5)

    print("KERNEL_OK")
</pallas_src>

<mosaic_0001>
module attributes {stable_mosaic.version = 11 : i64} {
  func.func @affine_kernel(%arg0: i32, %arg1: memref<2xf32, #tpu.memory_space<smem>>, %arg2: memref<1x128xf32, #tpu.memory_space<vmem>>, %arg3: memref<1x128xf32, #tpu.memory_space<vmem>>) attributes {dimension_semantics = [#tpu.dimension_semantics<parallel>], iteration_bounds = array<i64: 1>, scalar_prefetch = 0 : i64, scratch_operands = 0 : i64, tpu.core_type = #tpu.core_type<tc>, window_params = [{transform_indices = @transform_0, window_bounds = array<i64: 2>}, {transform_indices = @transform_1, window_bounds = array<i64: 1, 128>}, {transform_indices = @transform_2, window_bounds = array<i64: 1, 128>}]} {
    %c0 = arith.constant 0 : index
    %c0_0 = arith.constant 0 : index
    %0 = vector.load %arg2[%c0, %c0_0] : memref<1x128xf32, #tpu.memory_space<vmem>>, vector<1x128xf32>
    %c0_1 = arith.constant 0 : index
    %1 = memref.load %arg1[%c0_1] : memref<2xf32, #tpu.memory_space<smem>>
    %2 = vector.broadcast %1 : f32 to vector<1x128xf32>
    %3 = arith.mulf %0, %2 : vector<1x128xf32>
    %c1 = arith.constant 1 : index
    %4 = memref.load %arg1[%c1] : memref<2xf32, #tpu.memory_space<smem>>
    %5 = vector.broadcast %4 : f32 to vector<1x128xf32>
    %6 = arith.addf %3, %5 : vector<1x128xf32>
    %c0_2 = arith.constant 0 : index
    %c0_3 = arith.constant 0 : index
    %7 = vector.load %arg3[%c0_2, %c0_3] : memref<1x128xf32, #tpu.memory_space<vmem>>, vector<1x128xf32>
    tpu.vector_store %arg3[%c0_2, %c0_3], %6 {strides = array<i32>} : memref<1x128xf32, #tpu.memory_space<vmem>>, vector<1x128xf32>,
    return
  }
  func.func @transform_0(%arg0: i32) -> i32 {
    %c0_i32 = arith.constant 0 : i32
    %c0_i32_0 = arith.constant 0 : i32
    return %c0_i32 : i32
  }
  func.func @transform_1(%arg0: i32) -> (i32, i32) {
    %c0_i32 = arith.constant 0 : i32
    %c0_i32_0 = arith.constant 0 : i32
    return %arg0, %c0_i32 : i32, i32
  }
  func.func @transform_2(%arg0: i32) -> (i32, i32) {
    %c0_i32 = arith.constant 0 : i32
    %c0_i32_0 = arith.constant 0 : i32
    return %arg0, %c0_i32 : i32, i32
  }
}

</mosaic_0001>

<bundles_post_ra>
// kernel: tpu_custom_call.1
= control target key start
LH: loop header
LB: loop body
LE: loop exit
PB: predicated region body
PF: predicated region fallthrough
CT: control target
= control target key end

     0   :  { %7 = vsyncpa [#allocation4], 0  ;;  %s107_s0 = inlined_call_operand.hbm [shape: f32[2], index: 0, kind: input, shape index: {}]   ;;  %s108_s1 = inlined_call_operand.vmem [shape: f32[1,128], index: 1, kind: input, shape index: {}]   ;;  %s109_s2 = inlined_call_operand.hbm [shape: f32[1,128], index: 2, kind: output, shape index: {}]  }
   0x1   :  { %8 = vsyncpa [#allocation3], 0  ;;  %s81_s9 = smov [#allocation2]  }
   0x2   :  { %16 = dma.hbm_to_smem %s107_s0, 16, %s81_s9, [#allocation4]  }
   0x3   :  { %77 = dma.done.wait [#allocation4], 16  }
   0x4   :  { %78 = vsyncadd [#allocation4], 4294967280 }
   0x5   :  { %22 = sfence }
   0x6   :  { %s24_s12 = sld [smem:[#allocation2]]  ;;  %v23_v0 = vld [vmem:[%s108_s1] sm:$0x1]  ;;  %s82_s16 = smov [#allocation5]  }
   0x7   :  { %s46_s13 = sld [smem:[#allocation2 + $0x1]]  ;;  %s37_s17 = sshll.u32 %s82_s16, 4  ;;  %s38_s17 = int_to_ptr.vmem [resolvable:$true] %s37_s17 }
   0x8   :  { %s57_s18 = scalar_lea.vmem %s38_s17, 16  ;;  %s61_s0 = scalar_lea.vmem %s38_s17, 32 }
   0x9   :  { %p58_p0 = scmp.ne.s32.totalorder %s38_s17, %s57_s18  ;;  %p62_p1 = scmp.lt.s32.totalorder %s38_s17, %s38_s17 }
   0xa   :  { %p63_p2 = scmp.lt.s32.totalorder %s61_s0, %s57_s18 }
   0xc   :  { %v25_v1 = vstv %s24_s12  ;;  %p64_p3 = por %p63_p2, %p62_p1 }
   0xd   :  { %v26_v2 = vmul.f32 %v25_v1, %v23_v0  ;;  %v28_v3 = vstv %s46_s13 }
   0xe   :  { %p65_p4 = pnand %p64_p3, %p58_p0 }
   0xf   :  { %v29_v4 = vadd.f32 %v28_v3, %v26_v2 }
  0x11   :  { %30 = vst [vmem:[#allocation5] sm:$0x1] %v29_v4 }
  0x12   :  { %68 = shalt.err (!%p65_p4)
}
  0x13   :  { %40 = dma.vmem_to_hbm [thread:$0]  %s38_s17, 16, %s109_s2, [#allocation3]  }
  0x14   :  { %79 = dma.done.wait [#allocation3], 16  }
  0x15   :  { %80 = vsyncadd [#allocation3], 4294967280 }
  0x16   :  { %44 = vsyncpa [#allocation3], 1 }
  0x17   :  { %45 = vsyncpa [#allocation4], 1 }

</bundles_post_ra>
